<compile_context>
chip_gen: v7x
topology: tpu7x:2x2x1
jax: 0.10.0
libtpu: 0.0.40
codegen_flags: <defaults>
</compile_context>

<pallas_src>
import functools

import jax
import jax.numpy as jnp
from jax.experimental import pallas as pl
from jax.experimental.pallas import tpu as pltpu


def _margin_loss_kernel(beta_ref, a_ref, n_ref, p_ref, psum_ref, pcnt_ref,
                        *, margin, eps, n_valid, row_tile):
    """One grid step: a row-tile of triplets -> one lane-dense partial row."""
    i = pl.program_id(0)

    beta = beta_ref[0]
    a = a_ref[...].astype(jnp.float32)
    neg = n_ref[...].astype(jnp.float32)
    pos = p_ref[...].astype(jnp.float32)

    dp = pos - a
    dn = neg - a
    # Per-row squared distance over the embedding (lane) axis -> (TN, 1).
    # (For very small D one could pack several rows per 128-lane vreg; the
    #  kernel is HBM-bandwidth bound at realistic embedding dims, so we keep
    #  the straightforward lane reduction.)
    d_ap = jnp.sqrt(jnp.sum(dp * dp, axis=-1, keepdims=True) + eps)
    d_an = jnp.sqrt(jnp.sum(dn * dn, axis=-1, keepdims=True) + eps)

    pos_loss = jnp.maximum(d_ap - beta + margin, 0.0)
    neg_loss = jnp.maximum(beta - d_an + margin, 0.0)
    # torch: (pos_loss > 0) + (neg_loss > 0) on bools == logical OR.
    pair = jnp.logical_or(pos_loss > 0.0, neg_loss > 0.0).astype(jnp.float32)

    # Mask rows that are zero-padding past the true N.
    row_ids = i * row_tile + jax.lax.broadcasted_iota(jnp.int32, (row_tile, 1), 0)
    valid = (row_ids < n_valid).astype(jnp.float32)

    tile_sum = jnp.sum((pos_loss + neg_loss) * valid)
    tile_cnt = jnp.sum(pair * valid)

    # Lane-dense (1, 128) partial rows -> unmasked stores; reduced in epilogue.
    psum_ref[...] = jnp.full((1, 128), tile_sum, jnp.float32)
    pcnt_ref[...] = jnp.full((1, 128), tile_cnt, jnp.float32)


def _vmem_capacity_bytes():
    try:
        return int(pltpu.get_tpu_info().vmem_capacity_bytes)
    except Exception:
        return 64 * 1024 * 1024  # conservative: v7x per-TensorCore VMEM


def _pick_row_tile(n_rows, d, itemsize):
    """Largest row tile whose double-buffered footprint stays well under VMEM."""
    vmem = _vmem_capacity_bytes()
    budget = vmem // 4                        # <= 1/4 of physical VMEM: headroom
    d_lanes = max(128, -(-d // 128) * 128)    # VMEM lane padding to 128
    per_row = 3 * 2 * d_lanes * itemsize      # 3 inputs x 2 pipeline buffers
    t = max(8, min(budget // per_row, 2048))
    t = (t // 8) * 8                          # sublane alignment
    n_pad8 = -(-n_rows // 8) * 8
    return int(min(t, n_pad8)), vmem


def margin_loss(anchor, negative, positive, beta, *, margin=0.2, eps=1e-8,
                row_tile=None):
    """Pallas MarginLoss forward.  anchor/negative/positive: (N, D)."""
    N, D = anchor.shape
    assert negative.shape == (N, D) and positive.shape == (N, D)

    itemsize = jnp.dtype(anchor.dtype).itemsize
    auto_tile, vmem = _pick_row_tile(N, D, itemsize)
    if row_tile is None:
        row_tile = auto_tile
    row_tile = max(8, (int(row_tile) // 8) * 8)

    num_tiles = -(-N // row_tile)
    n_pad = num_tiles * row_tile
    if n_pad != N:
        pad = ((0, n_pad - N), (0, 0))
        anchor = jnp.pad(anchor, pad)
        negative = jnp.pad(negative, pad)
        positive = jnp.pad(positive, pad)

    beta_arr = jnp.asarray(beta, jnp.float32).reshape((1,))

    emb_spec = pl.BlockSpec((row_tile, D), lambda i: (i, 0))
    part_spec = pl.BlockSpec((1, 128), lambda i: (i, 0))

    kernel = functools.partial(
        _margin_loss_kernel,
        margin=float(margin), eps=float(eps),
        n_valid=int(N), row_tile=int(row_tile))

    psum, pcnt = pl.pallas_call(
        kernel,
        out_shape=(jax.ShapeDtypeStruct((num_tiles, 128), jnp.float32),
                   jax.ShapeDtypeStruct((num_tiles, 128), jnp.float32)),
        grid_spec=pltpu.PrefetchScalarGridSpec(
            num_scalar_prefetch=0,
            grid=(num_tiles,),
            in_specs=[
                pl.BlockSpec(memory_space=pltpu.MemorySpace.SMEM),  # beta
                emb_spec,   # anchor
                emb_spec,   # negative
                emb_spec,   # positive
            ],
            out_specs=[part_spec, part_spec],
        ),
        compiler_params=pltpu.CompilerParams(
            dimension_semantics=("parallel",),
            vmem_limit_bytes=int(vmem // 2),
        ),
    )(beta_arr, anchor, negative, positive)

    # Tiny JAX epilogue: combine per-tile partials, divide by max(count, 1).
    total = jnp.sum(psum[:, 0])
    cnt = jnp.sum(pcnt[:, 0])
    return total / jnp.maximum(cnt, 1.0)


def _margin_loss_ref(anchor, negative, positive, beta, margin=0.2, eps=1e-8):
    d_ap = jnp.sqrt(jnp.sum((positive - anchor) ** 2, axis=1) + eps)
    d_an = jnp.sqrt(jnp.sum((negative - anchor) ** 2, axis=1) + eps)
    pos_loss = jnp.clip(d_ap - beta + margin, 0.0)
    neg_loss = jnp.clip(beta - d_an + margin, 0.0)
    pair_cnt = jnp.sum(jnp.logical_or(pos_loss > 0.0, neg_loss > 0.0)
                       .astype(jnp.float32))
    return jnp.sum(pos_loss + neg_loss) / jnp.maximum(pair_cnt, 1.0)


if __name__ == "__main__":
    # Deterministic parameter init (as in the module's __init__).
    beta_init = 1.2
    margin = 0.2

    key = jax.random.PRNGKey(0)
    ka, kn, kp = jax.random.split(key, 3)
    N, D = 8, 32
    anchor = jax.random.normal(ka, (N, D), jnp.float32)
    negative = jax.random.normal(kn, (N, D), jnp.float32)
    positive = anchor + 0.1 * jax.random.normal(kp, (N, D), jnp.float32)

    loss = margin_loss(anchor, negative, positive, beta_init, margin=margin)
    loss = jax.block_until_ready(loss)

    ref = _margin_loss_ref(anchor, negative, positive, beta_init, margin=margin)
    assert jnp.allclose(loss, ref, atol=1e-5, rtol=1e-5), (loss, ref)

    print("KERNEL_OK")
</pallas_src>

<mosaic_0001>
module attributes {stable_mosaic.version = 11 : i64} {
  func.func @_margin_loss_kernel(%arg0: i32, %arg1: memref<1xf32, #tpu.memory_space<smem>>, %arg2: memref<8x32xf32, #tpu.memory_space<vmem>>, %arg3: memref<8x32xf32, #tpu.memory_space<vmem>>, %arg4: memref<8x32xf32, #tpu.memory_space<vmem>>, %arg5: memref<1x128xf32, #tpu.memory_space<vmem>>, %arg6: memref<1x128xf32, #tpu.memory_space<vmem>>) attributes {dimension_semantics = [#tpu.dimension_semantics<parallel>], iteration_bounds = array<i64: 1>, scalar_prefetch = 0 : i64, scratch_operands = 0 : i64, tpu.core_type = #tpu.core_type<tc>, window_params = [{transform_indices = @transform_0, window_bounds = array<i64: 1>}, {transform_indices = @transform_1, window_bounds = array<i64: 8, 32>}, {transform_indices = @transform_2, window_bounds = array<i64: 8, 32>}, {transform_indices = @transform_3, window_bounds = array<i64: 8, 32>}, {transform_indices = @transform_4, window_bounds = array<i64: 1, 128>}, {transform_indices = @transform_5, window_bounds = array<i64: 1, 128>}]} {
    %c0 = arith.constant 0 : index
    %0 = memref.load %arg1[%c0] : memref<1xf32, #tpu.memory_space<smem>>
    %c0_0 = arith.constant 0 : index
    %c0_1 = arith.constant 0 : index
    %1 = vector.load %arg2[%c0_0, %c0_1] : memref<8x32xf32, #tpu.memory_space<vmem>>, vector<8x32xf32>
    %c0_2 = arith.constant 0 : index
    %c0_3 = arith.constant 0 : index
    %2 = vector.load %arg3[%c0_2, %c0_3] : memref<8x32xf32, #tpu.memory_space<vmem>>, vector<8x32xf32>
    %c0_4 = arith.constant 0 : index
    %c0_5 = arith.constant 0 : index
    %3 = vector.load %arg4[%c0_4, %c0_5] : memref<8x32xf32, #tpu.memory_space<vmem>>, vector<8x32xf32>
    %4 = arith.subf %3, %1 : vector<8x32xf32>
    %5 = arith.subf %2, %1 : vector<8x32xf32>
    %6 = arith.mulf %4, %4 : vector<8x32xf32>
    %cst = arith.constant dense<0.000000e+00> : vector<8xf32>
    %7 = vector.multi_reduction <add>, %6, %cst [1] : vector<8x32xf32> to vector<8xf32>
    %8 = vector.shape_cast %7 : vector<8xf32> to vector<8x1xf32>
    %cst_6 = arith.constant 9.99999993E-9 : f32
    %9 = vector.broadcast %cst_6 : f32 to vector<8x1xf32>
    %10 = arith.addf %8, %9 : vector<8x1xf32>
    %11 = math.sqrt %10 : vector<8x1xf32>
    %12 = arith.mulf %5, %5 : vector<8x32xf32>
    %cst_7 = arith.constant dense<0.000000e+00> : vector<8xf32>
    %13 = vector.multi_reduction <add>, %12, %cst_7 [1] : vector<8x32xf32> to vector<8xf32>
    %14 = vector.shape_cast %13 : vector<8xf32> to vector<8x1xf32>
    %cst_8 = arith.constant 9.99999993E-9 : f32
    %15 = vector.broadcast %cst_8 : f32 to vector<8x1xf32>
    %16 = arith.addf %14, %15 : vector<8x1xf32>
    %17 = math.sqrt %16 : vector<8x1xf32>
    %18 = vector.broadcast %0 : f32 to vector<8x1xf32>
    %19 = arith.subf %11, %18 : vector<8x1xf32>
    %cst_9 = arith.constant 2.000000e-01 : f32
    %20 = vector.broadcast %cst_9 : f32 to vector<8x1xf32>
    %21 = arith.addf %19, %20 : vector<8x1xf32>
    %cst_10 = arith.constant 0.000000e+00 : f32
    %22 = vector.broadcast %cst_10 : f32 to vector<8x1xf32>
    %23 = arith.maximumf %21, %22 : vector<8x1xf32>
    %24 = vector.broadcast %0 : f32 to vector<8x1xf32>
    %25 = arith.subf %24, %17 : vector<8x1xf32>
    %cst_11 = arith.constant 2.000000e-01 : f32
    %26 = vector.broadcast %cst_11 : f32 to vector<8x1xf32>
    %27 = arith.addf %25, %26 : vector<8x1xf32>
    %cst_12 = arith.constant 0.000000e+00 : f32
    %28 = vector.broadcast %cst_12 : f32 to vector<8x1xf32>
    %29 = arith.maximumf %27, %28 : vector<8x1xf32>
    %cst_13 = arith.constant 0.000000e+00 : f32
    %30 = vector.broadcast %cst_13 : f32 to vector<8x1xf32>
    %31 = arith.cmpf ogt, %23, %30 : vector<8x1xf32>
    %cst_14 = arith.constant 0.000000e+00 : f32
    %32 = vector.broadcast %cst_14 : f32 to vector<8x1xf32>
    %33 = arith.cmpf ogt, %29, %32 : vector<8x1xf32>
    %34 = arith.ori %31, %33 : vector<8x1xi1>
    %35 = arith.extui %34 : vector<8x1xi1> to vector<8x1xi32>
    %36 = arith.sitofp %35 : vector<8x1xi32> to vector<8x1xf32>
    %c8_i32 = arith.constant 8 : i32
    %37 = arith.muli %arg0, %c8_i32 : i32
    %38 = tpu.iota {dimensions = array<i32: 0>} : vector<8x1xi32>
    %39 = vector.broadcast %37 : i32 to vector<8x1xi32>
    %40 = arith.addi %39, %38 : vector<8x1xi32>
    %c8_i32_15 = arith.constant 8 : i32
    %41 = vector.broadcast %c8_i32_15 : i32 to vector<8x1xi32>
    %42 = arith.cmpi slt, %40, %41 : vector<8x1xi32>
    %43 = arith.extui %42 : vector<8x1xi1> to vector<8x1xi32>
    %44 = arith.sitofp %43 : vector<8x1xi32> to vector<8x1xf32>
    %45 = arith.addf %23, %29 : vector<8x1xf32>
    %46 = arith.mulf %45, %44 : vector<8x1xf32>
    %47 = vector.shape_cast %46 : vector<8x1xf32> to vector<1x8x1xf32>
    %cst_16 = arith.constant dense<0.000000e+00> : vector<1xf32>
    %48 = vector.multi_reduction <add>, %47, %cst_16 [1, 2] : vector<1x8x1xf32> to vector<1xf32>
    %49 = vector.shape_cast %48 : vector<1xf32> to vector<1x1x1xf32>
    %50 = vector.extract %49[0, 0, 0] : f32 from vector<1x1x1xf32>
    %51 = arith.mulf %36, %44 : vector<8x1xf32>
    %52 = vector.shape_cast %51 : vector<8x1xf32> to vector<1x8x1xf32>
    %cst_17 = arith.constant dense<0.000000e+00> : vector<1xf32>
    %53 = vector.multi_reduction <add>, %52, %cst_17 [1, 2] : vector<1x8x1xf32> to vector<1xf32>
    %54 = vector.shape_cast %53 : vector<1xf32> to vector<1x1x1xf32>
    %55 = vector.extract %54[0, 0, 0] : f32 from vector<1x1x1xf32>
    %56 = vector.broadcast %50 : f32 to vector<1x128xf32>
    %c0_18 = arith.constant 0 : index
    %c0_19 = arith.constant 0 : index
    %57 = vector.load %arg5[%c0_18, %c0_19] : memref<1x128xf32, #tpu.memory_space<vmem>>, vector<1x128xf32>
    tpu.vector_store %arg5[%c0_18, %c0_19], %56 {strides = array<i32>} : memref<1x128xf32, #tpu.memory_space<vmem>>, vector<1x128xf32>,
    %58 = vector.broadcast %55 : f32 to vector<1x128xf32>
    %c0_20 = arith.constant 0 : index
    %c0_21 = arith.constant 0 : index
    %59 = vector.load %arg6[%c0_20, %c0_21] : memref<1x128xf32, #tpu.memory_space<vmem>>, vector<1x128xf32>
    tpu.vector_store %arg6[%c0_20, %c0_21], %58 {strides = array<i32>} : memref<1x128xf32, #tpu.memory_space<vmem>>, vector<1x128xf32>,
    return
  }
  func.func @transform_0(%arg0: i32) -> i32 {
    %c0_i32 = arith.constant 0 : i32
    %c0_i32_0 = arith.constant 0 : i32
    return %c0_i32 : i32
  }
  func.func @transform_1(%arg0: i32) -> (i32, i32) {
    %c0_i32 = arith.constant 0 : i32
    %c0_i32_0 = arith.constant 0 : i32
    return %arg0, %c0_i32 : i32, i32
  }
  func.func @transform_2(%arg0: i32) -> (i32, i32) {
    %c0_i32 = arith.constant 0 : i32
    %c0_i32_0 = arith.constant 0 : i32
    return %arg0, %c0_i32 : i32, i32
  }
  func.func @transform_3(%arg0: i32) -> (i32, i32) {
    %c0_i32 = arith.constant 0 : i32
    %c0_i32_0 = arith.constant 0 : i32
    return %arg0, %c0_i32 : i32, i32
  }
  func.func @transform_4(%arg0: i32) -> (i32, i32) {
    %c0_i32 = arith.constant 0 : i32
    %c0_i32_0 = arith.constant 0 : i32
    return %arg0, %c0_i32 : i32, i32
  }
  func.func @transform_5(%arg0: i32) -> (i32, i32) {
    %c0_i32 = arith.constant 0 : i32
    %c0_i32_0 = arith.constant 0 : i32
    return %arg0, %c0_i32 : i32, i32
  }
}

</mosaic_0001>

<bundles_post_ra>
// kernel: tpu_custom_call.1
= control target key start
LH: loop header
LB: loop body
LE: loop exit
PB: predicated region body
PF: predicated region fallthrough
CT: control target
= control target key end

     0   :  { %12 = vsyncpa [#allocation4], 0  ;;  %s354_s0 = inlined_call_operand.<no memory space> [shape: f32[1], index: 0, kind: input, shape index: {}]   ;;  %s355_s1 = inlined_call_operand.hbm [shape: f32[8,32], index: 1, kind: input, shape index: {}]   ;;  %s356_s2 = inlined_call_operand.hbm [shape: f32[8,32], index: 2, kind: input, shape index: {}]   ;;  %s357_s3 = inlined_call_operand.vmem [shape: f32[8,32], index: 3, kind: input, shape index: {}]   ;;  %s358_s4 = inlined_call_operand.hbm [shape: f32[1,128], index: 4, kind: output, shape index: {0}]   ;;  %s359_s5 = inlined_call_operand.hbm [shape: f32[1,128], index: 5, kind: output, shape index: {1}]  }
   0x1   :  { %13 = vsyncpa [#allocation7], 0 }
   0x2   :  { %14 = vsyncpa [#allocation5], 0 }
   0x3   :  { %15 = vsyncpa [#allocation10], 0  ;;  %s265_s18 = smov [#allocation3]   ;;  %s266_s20 = smov [#allocation6]  }
   0x4   :  { %s24_s19 = sshll.u32 %s265_s18, 4  ;;  %s34_s21 = sshll.u32 %s266_s20, 4  ;;  %s25_s19 = int_to_ptr.vmem [resolvable:$true] %s24_s19  ;;  %s35_s21 = int_to_ptr.vmem [resolvable:$true] %s34_s21 }
   0x5   :  { %s169_s24 = scalar_lea.hbm %s355_s1, 128 }
   0x6   :  { %p170_p0 = scmp.ne.s32.totalorder %s355_s1, %s169_s24  ;;  %p173_p1 = scmp.lt.u32.totalorder %s169_s24, %s355_s1 }
   0x8   :  { %p175_p2 = pnand %p173_p1, %p170_p0 }
   0xa   :  { %178 = shalt.err (!%p175_p2)
}
   0xb   :  { %s179_s29 = scalar_lea.vmem %s25_s19, 128  ;;  %p184_p4 = scmp.lt.s32.totalorder %s25_s19, %s25_s19 }
   0xc   :  { %p180_p3 = scmp.ne.s32.totalorder %s25_s19, %s179_s29  ;;  %p185_p5 = scmp.lt.s32.totalorder %s179_s29, %s179_s29 }
   0xe   :  { %p186_p6 = por %p185_p5, %p184_p4 }
  0x10   :  { %p187_p7 = pnand %p186_p6, %p180_p3 }
  0x12   :  { %190 = shalt.err (!%p187_p7)
}
  0x13   :  { %27 = dma.hbm_to_vmem [thread:$0]  %s355_s1, 128, %s25_s19, [#allocation4]  }
  0x14   :  { %s191_s9 = scalar_lea.hbm %s356_s2, 128 }
  0x15   :  { %p192_p8 = scmp.ne.s32.totalorder %s356_s2, %s191_s9  ;;  %p195_p9 = scmp.lt.u32.totalorder %s191_s9, %s356_s2 }
  0x17   :  { %p197_p10 = pnand %p195_p9, %p192_p8 }
  0x19   :  { %200 = shalt.err (!%p197_p10)
}
  0x1a   :  { %s201_s14 = scalar_lea.vmem %s35_s21, 128  ;;  %p206_p12 = scmp.lt.s32.totalorder %s35_s21, %s35_s21 }
  0x1b   :  { %p202_p11 = scmp.ne.s32.totalorder %s35_s21, %s201_s14  ;;  %p207_p13 = scmp.lt.s32.totalorder %s201_s14, %s201_s14 }
  0x1d   :  { %p208_p0 = por %p207_p13, %p206_p12 }
  0x1f   :  { %p209_p1 = pnand %p208_p0, %p202_p11 }
  0x21   :  { %212 = shalt.err (!%p209_p1)
}
  0x22   :  { %37 = dma.hbm_to_vmem [thread:$0]  %s356_s2, 128, %s35_s21, [#allocation7]  }
  0x23   :  { %257 = dma.done.wait [#allocation4], 128  }
  0x24   :  { %258 = vsyncadd [#allocation4], 4294967168 }
  0x25   :  { %259 = dma.done.wait [#allocation7], 128  }
  0x26   :  { %260 = vsyncadd [#allocation7], 4294967168  ;;  %v47_v0 = vld [vmem:[#allocation3] sm:$0xff]  ;;  %v48_v2 = vld [vmem:[#allocation6] sm:$0xff]  ;;  %vm53_vm0 = vcmask 261120   ;;  %v77_v16 = vstv %s354_s0  ;;  %vm99_vm5 = vcmask 7168  }
  0x27   :  { %v49_v1 = vld [vmem:[%s357_s3] sm:$0xff]  ;;  %v51_v4 = vsub.f32 %v48_v2, %v47_v0  ;;  %v267_v32 = vmov 0.0   ;;  %s268_s0 = smov [#allocation8]   ;;  %s269_s20 = smov [#allocation9]  }
  0x28   :  { %v50_v3 = vsub.f32 %v49_v1, %v47_v0  ;;  %s131_s18 = sshll.u32 %s268_s0, 4  ;;  %s141_s21 = sshll.u32 %s269_s20, 4  ;;  %s132_s18 = int_to_ptr.vmem [resolvable:$true] %s131_s18  ;;  %s142_s21 = int_to_ptr.vmem [resolvable:$true] %s141_s21 }
  0x29   :  { %v65_v6 = vmul.f32 %v51_v4, %v51_v4  ;;  %s213_s22 = scalar_lea.vmem %s132_s18, 16  ;;  %s217_s23 = scalar_lea.vmem %s132_s18, 32 }
  0x2a   :  { %v52_v5 = vmul.f32 %v50_v3, %v50_v3  ;;  %p214_p2 = scmp.ne.s32.totalorder %s132_s18, %s213_s22  ;;  %p218_p3 = scmp.lt.s32.totalorder %s132_s18, %s132_s18 }
  0x2b   :  { %v66_v8 = vsel %vm53_vm0, %v65_v6, 0.0  ;;  %p219_p4 = scmp.lt.s32.totalorder %s217_s23, %s213_s22 }
  0x2c   :  { %v54_v7 = vsel %vm53_vm0, %v52_v5, 0.0 }
  0x2d   :  { %55 = vadd.xlane.f32.xlu0 %v54_v7  ;;  %p220_p5 = por %p219_p4, %p218_p3 }
  0x2f   :  { %p221_p6 = pnand %p220_p5, %p214_p2 }
  0x31   :  { %67 = vadd.xlane.f32.xlu0 %v66_v8 }
  0xba   :  { %v56_v9 = vpop.xlane.xlu0 %55 }
  0xbb   :  { %v57_v10 = vadd.f32 1e-08, %v56_v9 }
  0xbd   :  { %165 = vrsqrt.f32 %v57_v10  ;;  %vm60_vm1 = vcmp.eq.f32.partialorder %v57_v10, inf  ;;  %v63_v15 = vand.u32 2147483648, %v57_v10  ;;  %vm62_vm2 = vcmp.eq.f32.partialorder %v57_v10, 0.0 }
  0xbe   :  { %v68_v11 = vpop.xlane.xlu0 %67 }
  0xbf   :  { %v69_v12 = vadd.f32 1e-08, %v68_v11 }
  0xc1   :  { %167 = vrsqrt.f32 %v69_v12  ;;  %vm72_vm3 = vcmp.eq.f32.partialorder %v69_v12, inf  ;;  %v75_v22 = vand.u32 2147483648, %v69_v12  ;;  %vm74_vm4 = vcmp.eq.f32.partialorder %v69_v12, 0.0 }
  0xc7   :  { %v166_v13 = vpop.eup %165 }
  0xc8   :  { %v59_v14 = vmul.f32 %v166_v13, %v57_v10 }
  0xca   :  { %v61_v17 = vsel %vm60_vm1, %v57_v10, %v59_v14 }
  0xcb   :  { %v168_v18 = vpop.eup %167  ;;  %v64_v19 = vsel %vm62_vm2, %v63_v15, %v61_v17 }
  0xcc   :  { %v71_v20 = vmul.f32 %v168_v18, %v69_v12  ;;  %v78_v21 = vsub.f32 %v64_v19, %v77_v16 }
  0xce   :  { %v73_v23 = vsel %vm72_vm3, %v69_v12, %v71_v20  ;;  %v79_v24 = vadd.f32 0.2, %v78_v21 }
  0xcf   :  { %v76_v25 = vsel %vm74_vm4, %v75_v22, %v73_v23 }
  0xd0   :  { %v81_v26 = vsub.f32 %v77_v16, %v76_v25  ;;  %v80_v27 = vmax.f32 %v79_v24, 0.0 }
  0xd2   :  { %v82_v28 = vadd.f32 0.2, %v81_v26  ;;  %vm84_vm6 = vcmp.gt.f32.partialorder %v80_v27, 0.0 }
  0xd4   :  { %v83_v29 = vmax.f32 %v82_v28, 0.0 }
  0xd6   :  { %v97_v30 = vadd.f32 %v83_v29, %v80_v27  ;;  %vm85_vm7 = vcmp.gt.f32.partialorder %v83_v29, 0.0 }
  0xd7   :  { %vm86_vm8 = vmor %vm84_vm6, %vm85_vm7 }
  0xd8   :  { %v100_v31 = vsel %vm99_vm5, %v97_v30, 0.0  ;;  %v155_v33 = vsel %vm86_vm8, 1.0, %v267_v32 }
  0xd9   :  { %101 = vadd.xlane.f32.xlu1 %v100_v31  ;;  %v111_v34 = vsel %vm99_vm5, %v155_v33, 0.0 }
  0xdd   :  { %112 = vadd.xlane.f32.xlu1 %v111_v34 }
 0x166   :  { %v102_v35 = vpop.xlane.xlu1 %101 }
 0x167   :  { %v103_v36 = vrot.slane %v102_v35, 4 }
 0x169   :  { %v104_v37 = vadd.f32 %v103_v36, %v102_v35 }
 0x16a   :  { %v113_v38 = vpop.xlane.xlu1 %112 }
 0x16b   :  { %v105_v39 = vrot.slane %v104_v37, 2  ;;  %v114_v40 = vrot.slane %v113_v38, 4 }
 0x16d   :  { %v115_v41 = vadd.f32 %v114_v40, %v113_v38  ;;  %v106_v42 = vadd.f32 %v105_v39, %v104_v37 }
 0x16f   :  { %v116_v43 = vrot.slane %v115_v41, 2  ;;  %v107_v44 = vrot.slane %v106_v42, 1 }
 0x171   :  { %v117_v45 = vadd.f32 %v116_v43, %v115_v41  ;;  %v108_v46 = vadd.f32 %v107_v44, %v106_v42 }
 0x173   :  { %156 = vpush %v108_v46  ;;  %v118_v47 = vrot.slane %v117_v45, 1 }
 0x175   :  { %v119_v48 = vadd.f32 %v118_v47, %v117_v45 }
 0x177   :  { %158 = vpush %v119_v48 }
 0x1a4   :  { %s157_s19 = spop %156 }
 0x1a5   :  { %v121_v49 = vstv %s157_s19 }
 0x1a6   :  { %122 = vst [vmem:[#allocation8] sm:$0x1] %v121_v49 }
 0x1a7   :  { %224 = shalt.err (!%p221_p6)
}
 0x1a8   :  { %s225_s26 = scalar_lea.hbm %s358_s4, 16 }
 0x1a9   :  { %p226_p7 = scmp.ne.s32.totalorder %s358_s4, %s225_s26  ;;  %p229_p8 = scmp.lt.u32.totalorder %s225_s26, %s358_s4 }
 0x1ab   :  { %p231_p9 = pnand %p229_p8, %p226_p7 }
 0x1ad   :  { %234 = shalt.err (!%p231_p9)
}
 0x1ae   :  { %134 = dma.vmem_to_hbm [thread:$0]  %s132_s18, 16, %s358_s4, [#allocation5]  }
 0x1af   :  { %s159_s8 = spop %158  ;;  %s235_s9 = scalar_lea.vmem %s142_s21, 16 }
 0x1b0   :  { %v123_v50 = vstv %s159_s8  ;;  %p236_p10 = scmp.ne.s32.totalorder %s142_s21, %s235_s9  ;;  %s239_s10 = scalar_lea.vmem %s142_s21, 32 }
 0x1b1   :  { %124 = vst [vmem:[#allocation9] sm:$0x1] %v123_v50  ;;  %p240_p11 = scmp.lt.s32.totalorder %s142_s21, %s142_s21  ;;  %p241_p12 = scmp.lt.s32.totalorder %s239_s10, %s235_s9 }
 0x1b3   :  { %p242_p13 = por %p241_p12, %p240_p11 }
 0x1b5   :  { %p243_p0 = pnand %p242_p13, %p236_p10 }
 0x1b7   :  { %246 = shalt.err (!%p243_p0)
}
 0x1b8   :  { %s247_s13 = scalar_lea.hbm %s359_s5, 16 }
 0x1b9   :  { %p248_p1 = scmp.ne.s32.totalorder %s359_s5, %s247_s13  ;;  %p251_p2 = scmp.lt.u32.totalorder %s247_s13, %s359_s5 }
 0x1bb   :  { %p253_p3 = pnand %p251_p2, %p248_p1 }
 0x1bd   :  { %256 = shalt.err (!%p253_p3)
}
 0x1be   :  { %144 = dma.vmem_to_hbm [thread:$0]  %s142_s21, 16, %s359_s5, [#allocation10]  }
 0x1bf   :  { %261 = dma.done.wait [#allocation5], 16  }
 0x1c0   :  { %262 = vsyncadd [#allocation5], 4294967280 }
 0x1c1   :  { %263 = dma.done.wait [#allocation10], 16  }
 0x1c2   :  { %264 = vsyncadd [#allocation10], 4294967280 }
 0x1c3   :  { %151 = vsyncpa [#allocation4], 1 }
 0x1c4   :  { %152 = vsyncpa [#allocation7], 1 }
 0x1c5   :  { %153 = vsyncpa [#allocation5], 1 }
 0x1c6   :  { %154 = vsyncpa [#allocation10], 1 }

</bundles_post_ra>
